<compile_context>
chip_gen: v7x
topology: tpu7x:2x2x1
jax: 0.10.0
libtpu: 0.0.40
codegen_flags: <defaults>
</compile_context>

<pallas_src>
import functools

import jax
import jax.numpy as jnp
from jax.experimental import pallas as pl
from jax.experimental.pallas import tpu as pltpu


def _round_up(n: int, m: int) -> int:
    return pl.cdiv(n, m) * m


def _vmem_capacity_bytes() -> int:
    try:
        return int(pltpu.get_tpu_info().vmem_capacity_bytes)
    except Exception:
        return 64 << 20  # conservative: v7x per-TC capacity


def _pick_tf(F: int, D: int, w_bytes: int, weight_budget: int) -> int:
    """Hidden-dim tile.

    Whole-F resident (single f step, single-buffered) if w1+w2 fit the weight
    budget; otherwise the largest lane-aligned divisor of F whose
    double-buffered (D,tf) + (tf,D) tiles fit.
    """
    if 2 * D * F * w_bytes <= weight_budget or F % 128 != 0:
        return F
    max_tf = weight_budget // (2 * 2 * D * w_bytes)  # 2 tiles x 2 buffers
    best = None
    tf = 128
    while tf <= F:
        if F % tf == 0 and tf <= max_tf:
            best = tf
        tf += 128
    return best if best is not None else 128


def _ffn_kernel(x_ref, w1_ref, b1_ref, w2_ref, b2_ref, g_ref, beta_ref,
                o_ref, acc_ref, *, eps: float):
    # x_ref: (TM, D) resident across the F axis; w1_ref: (D, TF);
    # w2_ref: (TF, D); b1_ref: (1, TF); b2/gamma/beta: (1, D).
    f = pl.program_id(1)

    @pl.when(f == 0)
    def _():
        acc_ref[...] = jnp.zeros_like(acc_ref)

    # --- w1 tile + ReLU: native-dtype MXU operands, f32 accumulate ---
    h = jnp.dot(x_ref[...], w1_ref[...], preferred_element_type=jnp.float32)
    h = jnp.maximum(h + b1_ref[...].astype(jnp.float32), 0.0)

    # --- w2 tile: accumulate the partial (TM, D) product in f32 scratch ---
    acc_ref[...] += jnp.dot(h.astype(w2_ref.dtype), w2_ref[...],
                            preferred_element_type=jnp.float32)

    # --- epilogue on the last hidden-dim step ---
    @pl.when(f == pl.num_programs(1) - 1)
    def _():
        out = acc_ref[...] + b2_ref[...].astype(jnp.float32)
        # dropout(p=0.0) == identity; residual + LayerNorm in f32.
        y = x_ref[...].astype(jnp.float32) + out
        mean = jnp.mean(y, axis=-1, keepdims=True)
        yc = y - mean
        var = jnp.mean(yc * yc, axis=-1, keepdims=True)
        normed = yc * jax.lax.rsqrt(var + eps)
        normed = (normed * g_ref[...].astype(jnp.float32)
                  + beta_ref[...].astype(jnp.float32))
        o_ref[...] = normed.astype(o_ref.dtype)


def positional_wise_feed_forward(x, w1, b1, w2, b2, gamma, beta,
                                 *, eps: float = 1e-5, tm: int = 256,
                                 tf: int | None = None):
    """Fused FFN + residual + LayerNorm.

    x: (B, S, D).  w1: (D, F) (PyTorch Linear weight transposed), b1: (F,),
    w2: (F, D), b2: (D,), gamma/beta: (D,).
    """
    B, S, D = x.shape
    F = w1.shape[1]
    rows = B * S

    act_bytes = jnp.dtype(x.dtype).itemsize
    w_bytes = jnp.dtype(w1.dtype).itemsize

    cap = _vmem_capacity_bytes()
    cap_limit = int(cap * 0.8)  # headroom below physical VMEM (~51 MiB on v7x)

    # --- hidden-dim (F) tiling ---
    if tf is None:
        tf = _pick_tf(F, D, w_bytes, weight_budget=int(cap * 0.45))
    if tf <= 0 or F % tf != 0:
        tf = F
    n_f = F // tf
    w_buf = 1 if n_f == 1 else 2  # resident weights are single-buffered

    # --- row tiling: keep >= 2 row steps when rows > 8 (both v7x TCs busy),
    #     multiple of 8 sublanes, default 256 (sweep 512 on v6e) ---
    if rows <= 8:
        tm_eff = 8
    else:
        tm_eff = max(8, min(tm, _round_up(pl.cdiv(rows, 2), 8)))

    def _budget(tm_: int) -> int:
        io = 2 * 2 * tm_ * D * act_bytes                # x + out tiles, 2-deep
        w = w_buf * 2 * D * tf * w_bytes                # w1 + w2 tiles
        params = w_buf * 8 * tf * w_bytes + 3 * 8 * D * 4  # b1 + (b2,g,beta), sublane-padded
        acc = tm_ * D * 4                               # f32 accumulator scratch
        inter = tm_ * (tf + 2 * D) * 4                  # h / y f32 temporaries
        return int(1.3 * (io + w + params + acc + inter)) + (4 << 20)

    while _budget(tm_eff) > cap_limit and tm_eff > 8:
        tm_eff = max(8, _round_up(tm_eff // 2, 8))

    n_i = pl.cdiv(rows, tm_eff)  # ragged last row-block handled by masked I/O
    vmem_limit = int(min(cap_limit, _budget(tm_eff)))

    x2 = x.reshape(rows, D)
    b1_2 = b1.reshape(1, F)
    b2_2 = b2.reshape(1, D)
    g_2 = gamma.reshape(1, D)
    beta_2 = beta.reshape(1, D)

    # Scheduler hint: weights are re-read per row tile only when F is tiled.
    weight_hbm = 2 * D * F * w_bytes * (1 if n_f == 1 else n_i)
    cost = pl.CostEstimate(
        flops=int(4 * rows * D * F + 10 * rows * D),
        transcendentals=int(rows),
        bytes_accessed=int(2 * rows * D * act_bytes + weight_hbm + (F + 3 * D) * 4),
    )

    # Single-buffer inputs whose block index never changes across the grid.
    w_kwargs = dict(pipeline_mode=pl.Buffered(1)) if n_f == 1 else {}
    p_kwargs = dict(pipeline_mode=pl.Buffered(1))

    out2 = pl.pallas_call(
        functools.partial(_ffn_kernel, eps=eps),
        out_shape=jax.ShapeDtypeStruct((rows, D), x.dtype),
        grid_spec=pltpu.PrefetchScalarGridSpec(
            num_scalar_prefetch=0,
            grid=(n_i, n_f),
            in_specs=[
                pl.BlockSpec((tm_eff, D), lambda i, f: (i, 0)),           # x (resident over f)
                pl.BlockSpec((D, tf), lambda i, f: (0, f), **w_kwargs),   # w1 tile
                pl.BlockSpec((1, tf), lambda i, f: (0, f), **w_kwargs),   # b1 tile
                pl.BlockSpec((tf, D), lambda i, f: (f, 0), **w_kwargs),   # w2 tile
                pl.BlockSpec((1, D), lambda i, f: (0, 0), **p_kwargs),    # b2
                pl.BlockSpec((1, D), lambda i, f: (0, 0), **p_kwargs),    # gamma
                pl.BlockSpec((1, D), lambda i, f: (0, 0), **p_kwargs),    # beta
            ],
            out_specs=pl.BlockSpec((tm_eff, D), lambda i, f: (i, 0)),
            scratch_shapes=[pltpu.VMEM((tm_eff, D), jnp.float32)],
        ),
        compiler_params=pltpu.CompilerParams(
            dimension_semantics=("parallel", "arbitrary"),
            vmem_limit_bytes=vmem_limit,
        ),
        cost_estimate=cost,
    )(x2, w1, b1_2, w2, b2_2, g_2, beta_2)

    return out2.reshape(B, S, D)


def _reference(x, w1, b1, w2, b2, gamma, beta, eps=1e-5):
    h = jnp.maximum(x @ w1 + b1, 0.0)
    out = h @ w2 + b2
    y = x + out
    mean = jnp.mean(y, axis=-1, keepdims=True)
    var = jnp.mean((y - mean) ** 2, axis=-1, keepdims=True)
    return (y - mean) * jax.lax.rsqrt(var + eps) * gamma + beta


if __name__ == "__main__":
    # Small shapes consistent with the module (d_model / ffn_dim scaled down).
    B, S, D, FF = 2, 16, 128, 256

    key = jax.random.PRNGKey(0)
    kx, k1, kb1, k2, kb2 = jax.random.split(key, 5)

    x = jax.random.normal(kx, (B, S, D), dtype=jnp.float32)

    # Deterministic parameter init (uniform, PyTorch-Linear-like bound).
    bound1 = 1.0 / (D ** 0.5)
    bound2 = 1.0 / (FF ** 0.5)
    w1 = jax.random.uniform(k1, (D, FF), jnp.float32, -bound1, bound1)
    b1 = jax.random.uniform(kb1, (FF,), jnp.float32, -bound1, bound1)
    w2 = jax.random.uniform(k2, (FF, D), jnp.float32, -bound2, bound2)
    b2 = jax.random.uniform(kb2, (D,), jnp.float32, -bound2, bound2)
    gamma = jnp.ones((D,), jnp.float32)   # nn.LayerNorm default weight
    beta = jnp.zeros((D,), jnp.float32)   # nn.LayerNorm default bias

    ref = _reference(x, w1, b1, w2, b2, gamma, beta)

    # 1) f32 path, resident weights (single f step, Buffered(1) on weights).
    out = jax.block_until_ready(
        positional_wise_feed_forward(x, w1, b1, w2, b2, gamma, beta))
    assert out.shape == (B, S, D)
    assert jnp.allclose(out, ref, atol=1e-4, rtol=1e-4), "f32 mismatch vs reference"

    # 2) Non-divisible row count (ragged last row block, no wrapper padding).
    B2, S2 = 3, 10
    x_odd = jax.random.normal(jax.random.PRNGKey(1), (B2, S2, D), dtype=jnp.float32)
    out_odd = jax.block_until_ready(
        positional_wise_feed_forward(x_odd, w1, b1, w2, b2, gamma, beta))
    ref_odd = _reference(x_odd, w1, b1, w2, b2, gamma, beta)
    assert out_odd.shape == (B2, S2, D)
    assert jnp.allclose(out_odd, ref_odd, atol=1e-4, rtol=1e-4), "ragged-tail mismatch"

    # 3) bf16 path: native bf16 MXU operands, f32 accumulate + f32 epilogue.
    to_bf16 = lambda a: a.astype(jnp.bfloat16)
    out_bf16 = jax.block_until_ready(
        positional_wise_feed_forward(to_bf16(x), to_bf16(w1), to_bf16(b1),
                                     to_bf16(w2), to_bf16(b2),
                                     to_bf16(gamma), to_bf16(beta)))
    assert out_bf16.dtype == jnp.bfloat16
    assert jnp.allclose(out_bf16.astype(jnp.float32), ref, atol=1e-1, rtol=1e-1), \
        "bf16 mismatch vs reference"

    # 4) Forced F tiling (tf=128 -> 2 reduction steps): exercises the streamed
    #    weight tiles + f32 accumulator + pl.when epilogue path.
    out_tiled = jax.block_until_ready(
        positional_wise_feed_forward(x, w1, b1, w2, b2, gamma, beta, tf=128))
    assert jnp.allclose(out_tiled, ref, atol=1e-4, rtol=1e-4), "F-tiled mismatch"

    # TODO(synk): nn.Dropout with p > 0 (training mode) is not implemented;
    # the reference module uses p = 0.0, i.e. identity.
    print("KERNEL_OK")
</pallas_src>

<mosaic_0001>
module attributes {stable_mosaic.version = 11 : i64} {
  func.func @_ffn_kernel(%arg0: i32, %arg1: i32, %arg2: memref<16x128xf32, #tpu.memory_space<vmem>>, %arg3: memref<128x256xf32, #tpu.memory_space<vmem>>, %arg4: memref<1x256xf32, #tpu.memory_space<vmem>>, %arg5: memref<256x128xf32, #tpu.memory_space<vmem>>, %arg6: memref<1x128xf32, #tpu.memory_space<vmem>>, %arg7: memref<1x128xf32, #tpu.memory_space<vmem>>, %arg8: memref<1x128xf32, #tpu.memory_space<vmem>>, %arg9: memref<16x128xf32, #tpu.memory_space<vmem>>, %arg10: memref<16x128xf32, #tpu.memory_space<vmem>>) attributes {dimension_semantics = [#tpu.dimension_semantics<parallel>, #tpu.dimension_semantics<arbitrary>], iteration_bounds = array<i64: 2, 1>, scalar_prefetch = 0 : i64, scratch_operands = 1 : i64, tpu.core_type = #tpu.core_type<tc>, window_params = [{transform_indices = @transform_0, window_bounds = array<i64: 16, 128>}, {pipeline_mode = #tpu.pipeline_mode<synchronous>, transform_indices = @transform_1, window_bounds = array<i64: 128, 256>}, {pipeline_mode = #tpu.pipeline_mode<synchronous>, transform_indices = @transform_2, window_bounds = array<i64: 1, 256>}, {pipeline_mode = #tpu.pipeline_mode<synchronous>, transform_indices = @transform_3, window_bounds = array<i64: 256, 128>}, {pipeline_mode = #tpu.pipeline_mode<synchronous>, transform_indices = @transform_4, window_bounds = array<i64: 1, 128>}, {pipeline_mode = #tpu.pipeline_mode<synchronous>, transform_indices = @transform_5, window_bounds = array<i64: 1, 128>}, {pipeline_mode = #tpu.pipeline_mode<synchronous>, transform_indices = @transform_6, window_bounds = array<i64: 1, 128>}, {transform_indices = @transform_7, window_bounds = array<i64: 16, 128>}]} {
    %c0_i32 = arith.constant 0 : i32
    %0 = arith.cmpi eq, %arg1, %c0_i32 : i32
    %1 = arith.extui %0 : i1 to i32
    %c0_i32_0 = arith.constant 0 : i32
    %2 = arith.cmpi ne, %1, %c0_i32_0 : i32
    scf.if %2 {
      %cst_16 = arith.constant 0.000000e+00 : f32
      %19 = vector.broadcast %cst_16 : f32 to vector<16x128xf32>
      %c0_17 = arith.constant 0 : index
      %c0_18 = arith.constant 0 : index
      %20 = vector.load %arg10[%c0_17, %c0_18] : memref<16x128xf32, #tpu.memory_space<vmem>>, vector<16x128xf32>
      tpu.vector_store %arg10[%c0_17, %c0_18], %19 {strides = array<i32>} : memref<16x128xf32, #tpu.memory_space<vmem>>, vector<16x128xf32>,
    } else {
    }
    %c0 = arith.constant 0 : index
    %c0_1 = arith.constant 0 : index
    %3 = vector.load %arg2[%c0, %c0_1] : memref<16x128xf32, #tpu.memory_space<vmem>>, vector<16x128xf32>
    %c0_2 = arith.constant 0 : index
    %c0_3 = arith.constant 0 : index
    %4 = vector.load %arg3[%c0_2, %c0_3] : memref<128x256xf32, #tpu.memory_space<vmem>>, vector<128x256xf32>
    %cst = arith.constant dense<0.000000e+00> : vector<16x256xf32>
    %5 = tpu.matmul %3, %4, %cst {dimension_numbers = #tpu.dot_dimension_numbers<[1], [0], [0], [1], [0, 0, 1, 1], [], []>} : vector<16x128xf32>, vector<128x256xf32>, vector<16x256xf32> -> vector<16x256xf32>
    %c0_4 = arith.constant 0 : index
    %c0_5 = arith.constant 0 : index
    %6 = vector.load %arg4[%c0_4, %c0_5] : memref<1x256xf32, #tpu.memory_space<vmem>>, vector<1x256xf32>
    %7 = vector.broadcast %6 : vector<1x256xf32> to vector<16x256xf32>
    %8 = arith.addf %5, %7 : vector<16x256xf32>
    %cst_6 = arith.constant 0.000000e+00 : f32
    %9 = vector.broadcast %cst_6 : f32 to vector<16x256xf32>
    %10 = arith.maximumf %8, %9 : vector<16x256xf32>
    %c0_7 = arith.constant 0 : index
    %c0_8 = arith.constant 0 : index
    %11 = vector.load %arg10[%c0_7, %c0_8] : memref<16x128xf32, #tpu.memory_space<vmem>>, vector<16x128xf32>
    %c0_9 = arith.constant 0 : index
    %c0_10 = arith.constant 0 : index
    %12 = vector.load %arg5[%c0_9, %c0_10] : memref<256x128xf32, #tpu.memory_space<vmem>>, vector<256x128xf32>
    %cst_11 = arith.constant dense<0.000000e+00> : vector<16x128xf32>
    %13 = tpu.matmul %10, %12, %cst_11 {dimension_numbers = #tpu.dot_dimension_numbers<[1], [0], [0], [1], [0, 0, 1, 1], [], []>} : vector<16x256xf32>, vector<256x128xf32>, vector<16x128xf32> -> vector<16x128xf32>
    %14 = arith.addf %11, %13 : vector<16x128xf32>
    %c0_12 = arith.constant 0 : index
    %c0_13 = arith.constant 0 : index
    %15 = vector.load %arg10[%c0_12, %c0_13] : memref<16x128xf32, #tpu.memory_space<vmem>>, vector<16x128xf32>
    tpu.vector_store %arg10[%c0_12, %c0_13], %14 {strides = array<i32>} : memref<16x128xf32, #tpu.memory_space<vmem>>, vector<16x128xf32>,
    %c0_i32_14 = arith.constant 0 : i32
    %16 = arith.cmpi eq, %arg1, %c0_i32_14 : i32
    %17 = arith.extui %16 : i1 to i32
    %c0_i32_15 = arith.constant 0 : i32
    %18 = arith.cmpi ne, %17, %c0_i32_15 : i32
    scf.if %18 {
      %c0_16 = arith.constant 0 : index
      %c0_17 = arith.constant 0 : index
      %19 = vector.load %arg10[%c0_16, %c0_17] : memref<16x128xf32, #tpu.memory_space<vmem>>, vector<16x128xf32>
      %c0_18 = arith.constant 0 : index
      %c0_19 = arith.constant 0 : index
      %20 = vector.load %arg6[%c0_18, %c0_19] : memref<1x128xf32, #tpu.memory_space<vmem>>, vector<1x128xf32>
      %21 = vector.broadcast %20 : vector<1x128xf32> to vector<16x128xf32>
      %22 = arith.addf %19, %21 : vector<16x128xf32>
      %c0_20 = arith.constant 0 : index
      %c0_21 = arith.constant 0 : index
      %23 = vector.load %arg2[%c0_20, %c0_21] : memref<16x128xf32, #tpu.memory_space<vmem>>, vector<16x128xf32>
      %24 = arith.addf %23, %22 : vector<16x128xf32>
      %cst_22 = arith.constant dense<0.000000e+00> : vector<16xf32>
      %25 = vector.multi_reduction <add>, %24, %cst_22 [1] : vector<16x128xf32> to vector<16xf32>
      %26 = vector.shape_cast %25 : vector<16xf32> to vector<16x1xf32>
      %cst_23 = arith.constant 1.280000e+02 : f32
      %27 = vector.broadcast %cst_23 : f32 to vector<16x1xf32>
      %28 = arith.divf %26, %27 : vector<16x1xf32>
      %29 = vector.broadcast %28 : vector<16x1xf32> to vector<16x128xf32>
      %30 = arith.subf %24, %29 : vector<16x128xf32>
      %31 = arith.mulf %30, %30 : vector<16x128xf32>
      %cst_24 = arith.constant dense<0.000000e+00> : vector<16xf32>
      %32 = vector.multi_reduction <add>, %31, %cst_24 [1] : vector<16x128xf32> to vector<16xf32>
      %33 = vector.shape_cast %32 : vector<16xf32> to vector<16x1xf32>
      %cst_25 = arith.constant 1.280000e+02 : f32
      %34 = vector.broadcast %cst_25 : f32 to vector<16x1xf32>
      %35 = arith.divf %33, %34 : vector<16x1xf32>
      %cst_26 = arith.constant 9.99999974E-6 : f32
      %36 = vector.broadcast %cst_26 : f32 to vector<16x1xf32>
      %37 = arith.addf %35, %36 : vector<16x1xf32>
      %38 = math.rsqrt %37 : vector<16x1xf32>
      %39 = vector.broadcast %38 : vector<16x1xf32> to vector<16x128xf32>
      %40 = arith.mulf %30, %39 : vector<16x128xf32>
      %c0_27 = arith.constant 0 : index
      %c0_28 = arith.constant 0 : index
      %41 = vector.load %arg7[%c0_27, %c0_28] : memref<1x128xf32, #tpu.memory_space<vmem>>, vector<1x128xf32>
      %42 = vector.broadcast %41 : vector<1x128xf32> to vector<16x128xf32>
      %43 = arith.mulf %40, %42 : vector<16x128xf32>
      %c0_29 = arith.constant 0 : index
      %c0_30 = arith.constant 0 : index
      %44 = vector.load %arg8[%c0_29, %c0_30] : memref<1x128xf32, #tpu.memory_space<vmem>>, vector<1x128xf32>
      %45 = vector.broadcast %44 : vector<1x128xf32> to vector<16x128xf32>
      %46 = arith.addf %43, %45 : vector<16x128xf32>
      %c0_31 = arith.constant 0 : index
      %c0_32 = arith.constant 0 : index
      %47 = vector.load %arg9[%c0_31, %c0_32] : memref<16x128xf32, #tpu.memory_space<vmem>>, vector<16x128xf32>
      tpu.vector_store %arg9[%c0_31, %c0_32], %46 {strides = array<i32>} : memref<16x128xf32, #tpu.memory_space<vmem>>, vector<16x128xf32>,
    } else {
    }
    return
  }
  func.func @transform_0(%arg0: i32, %arg1: i32) -> (i32, i32) {
    %c0_i32 = arith.constant 0 : i32
    %c0_i32_0 = arith.constant 0 : i32
    return %arg0, %c0_i32 : i32, i32
  }
  func.func @transform_1(%arg0: i32, %arg1: i32) -> (i32, i32) {
    %c0_i32 = arith.constant 0 : i32
    %c0_i32_0 = arith.constant 0 : i32
    return %c0_i32, %arg1 : i32, i32
  }
  func.func @transform_2(%arg0: i32, %arg1: i32) -> (i32, i32) {
    %c0_i32 = arith.constant 0 : i32
    %c0_i32_0 = arith.constant 0 : i32
    return %c0_i32, %arg1 : i32, i32
  }
  func.func @transform_3(%arg0: i32, %arg1: i32) -> (i32, i32) {
    %c0_i32 = arith.constant 0 : i32
    %c0_i32_0 = arith.constant 0 : i32
    return %arg1, %c0_i32 : i32, i32
  }
  func.func @transform_4(%arg0: i32, %arg1: i32) -> (i32, i32) {
    %c0_i32 = arith.constant 0 : i32
    %c0_i32_0 = arith.constant 0 : i32
    %c0_i32_1 = arith.constant 0 : i32
    return %c0_i32, %c0_i32_0 : i32, i32
  }
  func.func @transform_5(%arg0: i32, %arg1: i32) -> (i32, i32) {
    %c0_i32 = arith.constant 0 : i32
    %c0_i32_0 = arith.constant 0 : i32
    %c0_i32_1 = arith.constant 0 : i32
    return %c0_i32, %c0_i32_0 : i32, i32
  }
  func.func @transform_6(%arg0: i32, %arg1: i32) -> (i32, i32) {
    %c0_i32 = arith.constant 0 : i32
    %c0_i32_0 = arith.constant 0 : i32
    %c0_i32_1 = arith.constant 0 : i32
    return %c0_i32, %c0_i32_0 : i32, i32
  }
  func.func @transform_7(%arg0: i32, %arg1: i32) -> (i32, i32) {
    %c0_i32 = arith.constant 0 : i32
    %c0_i32_0 = arith.constant 0 : i32
    return %arg0, %c0_i32 : i32, i32
  }
}

</mosaic_0001>

<bundles_post_ra>
// kernel: tpu_custom_call.1
= control target key start
LH: loop header
LB: loop body
LE: loop exit
PB: predicated region body
PF: predicated region fallthrough
CT: control target
= control target key end

     0   :  { %12 = vsyncpa [#allocation4], 0  ;;  %s1543_s0 = inlined_call_operand.hbm [shape: f32[32,128], index: 0, kind: input, shape index: {}]   ;;  %s1544_s1 = inlined_call_operand.hbm [shape: f32[128,256], index: 1, kind: input, shape index: {}]   ;;  %s1545_s2 = inlined_call_operand.vmem [shape: f32[1,256], index: 2, kind: input, shape index: {}]   ;;  %s1546_s3 = inlined_call_operand.hbm [shape: f32[256,128], index: 3, kind: input, shape index: {}]   ;;  %s1547_s4 = inlined_call_operand.vmem [shape: f32[1,128], index: 4, kind: input, shape index: {}]   ;;  %s1548_s5 = inlined_call_operand.vmem [shape: f32[1,128], index: 5, kind: input, shape index: {}]   ;;  %s1549_s6 = inlined_call_operand.vmem [shape: f32[1,128], index: 6, kind: input, shape index: {}]   ;;  %s1550_s7 = inlined_call_operand.hbm [shape: f32[32,128], index: 7, kind: output, shape index: {}]  }
   0x1   :  { %14 = vsyncpa [#allocation4 + $0x1], 0 }
   0x2   :  { %15 = vsyncpa [#allocation7], 0 }
   0x3   :  { %16 = vsyncpa [#allocation5], 0 }
   0x4   :  { %18 = vsyncpa [#allocation5 + $0x1], 0  ;;  %s1260_s24 = smov 0   ;;  %s1262_s25 = smov 0  }
   0x5   :  { %s1264_s26 = smov 0   ;;  %s1266_s27 = smov 0  }
   0x6   :  { %s1268_s28 = smov 0   ;;  %s1270_s29 = smov 0  }
   0x7 LB: > { %1558 = sst [smem:[#allocation13_spill]] %s1187_s24  ;;  %s814_s30 = sadd.s32 4294967295, %s1207_s29   ;;  %s1207_s29 = sphi %s1270_s29, %s24_s29   ;;  %s1203_s28 = sphi %s1268_s28, %s1580_s28   ;;  %s1199_s27 = sphi %s1266_s27, %s1579_s27   ;;  %s1195_s26 = sphi %s1264_s26, %s1578_s26   ;;  %s1191_s25 = sphi %s1262_s25, %s1577_s25   ;;  %s1187_s24 = sphi %s1260_s24, %s1576_s24  }
   0x8   : > { %s815_s8 = sadd.s32 4294967294, %s1207_s29   ;;  %p56_p0 = scmp.ne.s32.totalorder %s1191_s25, %s1187_s24 }
   0x9   : > { %p1294_p1 = scmp.eq.s32.totalorder %s814_s30, 0  ;;  %p1298_p2 = scmp.eq.s32.totalorder %s814_s30, 1 }
   0xa   : > { %p227_p3 = scmp.eq.s32.totalorder %s815_s8, 1  ;;  %p816_p5 = scmp.ge.s32.totalorder %s1207_s29, 1 }
   0xb   : > { %s1559_s9 = scalar_select %p1294_p1, 1, 0 }
   0xc   : > { %p1304_p4 = por %p1294_p1, %p56_p0  ;;  %p1309_p6 = por %p227_p3, %p56_p0 }
   0xd   : > { %p234_p7 = scmp.lt.s32.totalorder %s1207_s29, 3  ;;  %s1209_s14 = smov [#allocation6]  }
   0xe   : > { %s1561_s11 = scalar_select %p1304_p4, 1, 0 }
   0xf   : > { %s1562_s12 = scalar_select %p1309_p6, 1, 0 }
  0x10   : > { %p1314_p8 = pnand %p816_p5, %p234_p7  ;;  %s249_s15 = sshll.u32 %s1209_s14, 4  ;;  %s1318_s15 = int_to_ptr.vmem [resolvable:$true] %s249_s15 }
  0x11   : > { %1563 = sst [smem:[#allocation14_spill]] %s1562_s12  ;;  %s1210_s17 = smov [#allocation8]  }
  0x12   : > { %p953_p9 = pneg %p1314_p8  ;;  %s273_s18 = sshll.u32 %s1210_s17, 4  ;;  %s1329_s18 = int_to_ptr.vmem [resolvable:$true] %s273_s18 }
  0x13   : > { %s1035_s21 = scalar_lea.hbm %s1544_s1, 4096 }
  0x14   : > { %p1325_p11 = pnand %p953_p9, %p1294_p1  ;;  %p1036_p12 = scmp.ne.s32.totalorder %s1544_s1, %s1035_s21 }
  0x15   : > { %p1042_p5 = scmp.lt.u32.totalorder %s1035_s21, %s1544_s1 }
  0x16   : > { %p1037_p13 = pneg %p1325_p11 }
  0x18   : > { %p1038_p0 = pnand %p1037_p13, %p1036_p12 }
  0x1a   : > { %p1039_p3 = pneg %p1038_p0 }
  0x1c   : > { %p1044_p7 = pnand %p1042_p5, %p1039_p3 }
  0x1e   : > { %1047 = shalt.err (!%p1044_p7)
}
  0x1f   : > { %s1048_s14 = scalar_lea.vmem %s1318_s15, 4096  ;;  %p1056_p1 = scmp.lt.s32.totalorder %s1318_s15, %s1318_s15 }
  0x20   : > { %p1049_p9 = scmp.ne.s32.totalorder %s1318_s15, %s1048_s14  ;;  %p1057_p12 = scmp.lt.s32.totalorder %s1048_s14, %s1048_s14 }
  0x22   : > { %p1051_p10 = pnand %p1049_p9, %p1037_p13  ;;  %p1058_p0 = por %p1057_p12, %p1056_p1 }
  0x24   : > { %p1052_p6 = pneg %p1051_p10 }
  0x26   : > { %p1059_p4 = pnand %p1058_p0, %p1052_p6 }
  0x28   : > { %1062 = shalt.err (!%p1059_p4)
}
  0x29   : > { %s1211_s17 = smov 256   ;;  %s1212_s19 = smov 16  }
  0x2a   : > { %956 = dma.hbm_to_vmem [thread:$0]  (!%p1325_p11), %s1544_s1, 4096, %s1318_s15, [#allocation7], %s1211_s17, %s1211_s17, %s1212_s19  }
  0x2b   : > { %s1063_s30 = scalar_lea.hbm %s1546_s3, 4096 }
  0x2c   : > { %p1064_p1 = scmp.ne.s32.totalorder %s1546_s3, %s1063_s30  ;;  %p1070_p10 = scmp.lt.u32.totalorder %s1063_s30, %s1546_s3 }
  0x2e   : > { %p1066_p4 = pnand %p1064_p1, %p1037_p13 }
  0x30   : > { %p1067_p6 = pneg %p1066_p4 }
  0x32   : > { %p1072_p3 = pnand %p1070_p10, %p1067_p6 }
  0x34   : > { %1075 = shalt.err (!%p1072_p3)
}
  0x35   : > { %s1076_s15 = scalar_lea.vmem %s1329_s18, 4096  ;;  %p1084_p12 = scmp.lt.s32.totalorder %s1329_s18, %s1329_s18 }
  0x36   : > { %p1077_p5 = scmp.ne.s32.totalorder %s1329_s18, %s1076_s15  ;;  %p1085_p0 = scmp.lt.s32.totalorder %s1076_s15, %s1076_s15 }
  0x38   : > { %p1079_p7 = pnand %p1077_p5, %p1037_p13  ;;  %p1086_p1 = por %p1085_p0, %p1084_p12 }
  0x3a   : > { %p1080_p9 = pneg %p1079_p7 }
  0x3c   : > { %p1087_p4 = pnand %p1086_p1, %p1080_p9 }
  0x3e   : > { %1090 = shalt.err (!%p1087_p4)
}
  0x3f   : > { %s1556_s24 = smov 128   ;;  %s1214_s12 = smov 8  }
  0x40   : > { %959 = dma.hbm_to_vmem [thread:$0]  (!%p1325_p11), %s1546_s3, 4096, %s1329_s18, [#allocation7], %s1556_s24, %s1556_s24, %s1214_s12  }
  0x41   : > { %s36_s20 = sadd.s32 1, %s1203_s28  ;;  %s43_s21 = sadd.s32 1, %s1195_s26 }
  0x42   : > { %p38_p13 = scmp.ge.s32.totalorder %s36_s20, 2  ;;  %p50_p6 = scmp.ne.s32.totalorder %s1195_s26, %s1191_s25 }
  0x43   : > { %p51_p10 = scmp.eq.s32.totalorder %s1207_s29, 0  ;;  %p970_p3 = scmp.lt.s32.totalorder %s1207_s29, 2 }
  0x44   : > { %s1582_s20 = smov (%p38_p13, %s36_s20), 0  ;;  %p1396_p7 = por %p1298_p2, %p50_p6 }
  0x45   : > { %p52_p5 = por %p51_p10, %p50_p6  ;;  %s40_s22 = ssub.s32 %s1203_s28, %s1582_s20 }
  0x46   : > { %s1566_s16 = scalar_select %p1396_p7, 1, 0 }
  0x47   : > { %s296_s23 = sand.u32 1, %s1195_s26   ;;  %p41_p9 = scmp.eq.s32.totalorder %s40_s22, 0 }
  0x48   : > { %s821_s18 = sshll.u32 %s296_s23, 4  ;;  %s837_s30 = sshll.u32 %s1203_s28, 8 }
  0x49   : > { %s1405_s8 = scalar_select %p41_p9, %s1195_s26, %s43_s21  }
  0x4a   : > { %s1410_s17 = scalar_lea.hbm %s1543_s0, %s837_s30  ;;  %s300_s10 = scalar_lea.vmem [#allocation3], %s821_s18 }
  0x4b   : > { %s307_s19 = sshll.u32 %s300_s10, 4  ;;  %p1414_p2 = pnand %p970_p3, %p52_p5  ;;  %s1418_s19 = int_to_ptr.vmem [resolvable:$true] %s307_s19 }
  0x4c   : > { %s1420_s21 = scalar_lea.sflag [#allocation4], %s296_s23  ;;  %s1091_s22 = scalar_lea.hbm %s1410_s17, 256 }
  0x4d   : > { %p1092_p11 = scmp.ne.s32.totalorder %s1410_s17, %s1091_s22  ;;  %p1093_p12 = pneg %p1414_p2 }
  0x4e   : > { %s1096_s14 = scalar_lea.hbm %s1543_s0, 512  ;;  %p1097_p4 = scmp.lt.u32.totalorder %s1410_s17, %s1543_s0 }
  0x4f   : > { %p1094_p0 = pnand %p1093_p12, %p1092_p11  ;;  %p1098_p13 = scmp.lt.u32.totalorder %s1096_s14, %s1091_s22 }
  0x50   : > { %p1100_p10 = scmp.lt.u32.totalorder %s1091_s22, %s1410_s17 }
  0x51   : > { %p1095_p1 = pneg %p1094_p0  ;;  %p1099_p6 = por %p1098_p13, %p1097_p4 }
  0x53   : > { %p1101_p3 = por %p1100_p10, %p1099_p6 }
  0x55   : > { %p1102_p5 = pnand %p1101_p3, %p1095_p1 }
  0x57   : > { %1105 = shalt.err (!%p1102_p5)
}
  0x58   : > { %s1106_s23 = scalar_lea.vmem %s1418_s19, 256  ;;  %s1215_s18 = smov [#allocation3]  }
  0x59   : > { %p1107_p9 = scmp.ne.s32.totalorder %s1418_s19, %s1106_s23  ;;  %s1111_s30 = sshll.u32 %s1215_s18, 4  ;;  %s1112_s30 = int_to_ptr.vmem [resolvable:$false] %s1111_s30 }
  0x5a   : > { %s1113_s15 = scalar_lea.vmem %s1112_s30, 512  ;;  %p1114_p7 = scmp.lt.s32.totalorder %s1418_s19, %s1112_s30 }
  0x5b   : > { %p1109_p11 = pnand %p1107_p9, %p1093_p12  ;;  %p1115_p4 = scmp.lt.s32.totalorder %s1113_s15, %s1106_s23 }
  0x5d   : > { %p1110_p0 = pneg %p1109_p11  ;;  %p1116_p13 = por %p1115_p4, %p1114_p7 }
  0x5f   : > { %p1117_p6 = pnand %p1116_p13, %p1110_p0 }
  0x61   : > { %1120 = shalt.err (!%p1117_p6)
}
  0x62   : > { %s1568_s22 = smov 128   ;;  %319 = sbr.rel (%p1314_p8) target bundleno = 911 (0x38f), region = 48 }
  0x63   : > { %963 = dma.hbm_to_vmem [thread:$0]  (!%p1414_p2), %s1410_s17, 256, %s1418_s19, %s1420_s21, %s1568_s22, %s1568_s22, %s1214_s12  }
  0x64   : > { %s1454_s14 = sand.u32 (!%p1314_p8), 1, %s1191_s25   ;;  %p1569_p7 = scmp.ne.s32.totalorder (!%p1314_p8), %s1561_s11, 0 }
  0x65   : > { %s825_s10 = sshll.u32 (!%p1314_p8), %s1454_s14, 4  ;;  %s322_s23 = scalar_lea.sflag (!%p1314_p8), [#allocation4], %s1454_s14 }
  0x66   : > { %s1460_s24 = scalar_lea.vmem (!%p1314_p8), [#allocation3], %s825_s10 }
  0x69   : > { %1174 = dma.done.wait (%p1569_p7), %s322_s23, 256  }
  0x6a   : > { %1176 = vsyncadd (%p1569_p7), %s322_s23, 4294967040  ;;  %p1570_p2 = scmp.ne.s32.totalorder %s1559_s9, 0 }
  0x6c   : > { %1178 = dma.done.wait (%p1570_p2), [#allocation7], 8192  }
  0x6d   : > { %1180 = vsyncadd (%p1570_p2), [#allocation7], 4294959104  ;;  %v1216_v0 = vmov 0.0   ;;  %v386_v1 = vld [vmem:[#allocation6 + $0x8] sm:$0xff]  ;;  %v388_v2 = vld [vmem:[#allocation6 + $0x18] sm:$0xff]  ;;  %s838_s30 = sshll.u32 %s1199_s27, 8 }
  0x6e   : > { %493 = vmatprep.mubr.f32.mxu0 %v1216_v0  ;;  %v385_v3 = vld [vmem:[#allocation6] sm:$0xff]  ;;  %v877_v4 = vpack.c.bf16 %v388_v2, %v386_v1  ;;  %v387_v5 = vld [vmem:[#allocation6 + $0x10] sm:$0xff]  ;;  %v390_v6 = vld [vmem:[#allocation6 + $0x28] sm:$0xff]  ;;  %s367_s15 = scalar_lea.vmem [#allocation9], %s825_s10  ;;  %s1492_s9 = scalar_lea.hbm %s1550_s7, %s838_s30 }
  0x6f   : > { %v392_v7 = vld [vmem:[#allocation6 + $0x38] sm:$0xff]  ;;  %v879_v8 = vpack.c.bf16 %v387_v5, %v385_v3  ;;  %v389_v10 = vld [vmem:[#allocation6 + $0x20] sm:$0xff]  ;;  %v391_v11 = vld [vmem:[#allocation6 + $0x30] sm:$0xff]  ;;  %s698_s22 = sshll.u32 %s367_s15, 4  ;;  %s685_s11 = scalar_lea.sflag [#allocation5], %s1454_s14  ;;  %s1494_s22 = int_to_ptr.vmem [resolvable:$true] %s698_s22 }
  0x70   : > { %v881_v9 = vpack.c.bf16 %v392_v7, %v390_v6  ;;  %v394_v12 = vld [vmem:[#allocation6 + $0x48] sm:$0xff]  ;;  %878 = vmatprep.subr.bf16.mxu0 %v877_v4  ;;  %v396_v13 = vld [vmem:[#allocation6 + $0x58] sm:$0xff]  ;;  %v883_v14 = vpack.c.bf16 %v391_v11, %v389_v10  ;;  %v393_v16 = vld [vmem:[#allocation6 + $0x40] sm:$0xff]  ;;  %s1121_s13 = scalar_lea.vmem %s1494_s22, 256  ;;  %p1571_p12 = scmp.ne.s32.totalorder %s1566_s16, 0 }
  0x71   : > { %880 = vmatpush1.bf16.msra.mxu0 %v879_v8  ;;  %v885_v15 = vpack.c.bf16 %v396_v13, %v394_v12  ;;  %v395_v17 = vld [vmem:[#allocation6 + $0x50] sm:$0xff]  ;;  %v398_v18 = vld [vmem:[#allocation6 + $0x68] sm:$0xff]  ;;  %v400_v19 = vld [vmem:[#allocation6 + $0x78] sm:$0xff]  ;;  %p1122_p8 = scmp.ne.s32.totalorder %s1494_s22, %s1121_s13  ;;  %s1217_s27 = smov [#allocation9]  }
  0x72   : > { %882 = vmatprep.subr.bf16.mxu0 %v881_v9  ;;  %v887_v20 = vpack.c.bf16 %v395_v17, %v393_v16  ;;  %v889_v21 = vpack.c.bf16 %v400_v19, %v398_v18  ;;  %v397_v22 = vld [vmem:[#allocation6 + $0x60] sm:$0xff]  ;;  %v399_v23 = vld [vmem:[#allocation6 + $0x70] sm:$0xff]  ;;  %v402_v24 = vld [vmem:[#allocation6 + $0x88] sm:$0xff]  ;;  %s1125_s10 = sshll.u32 %s1217_s27, 4  ;;  %s1126_s10 = int_to_ptr.vmem [resolvable:$false] %s1125_s10 }
  0x73   : > { %v404_v25 = vld [vmem:[#allocation6 + $0x98] sm:$0xff]  ;;  %v401_v26 = vld [vmem:[#allocation6 + $0x80] sm:$0xff]  ;;  %v403_v27 = vld [vmem:[#allocation6 + $0x90] sm:$0xff]  ;;  %v891_v30 = vpack.c.bf16 %v399_v23, %v397_v22  ;;  %p1123_p1 = pnand %p1122_p8, %p1571_p12  ;;  %s1127_s12 = scalar_lea.vmem %s1126_s10, 512 }
  0x74   : > { %v528_v28 = vld [vmem:[#allocation8 + $0x80] sm:$0xff]  ;;  %v529_v29 = vld [vmem:[#allocation8 + $0x88] sm:$0xff]  ;;  %v530_v35 = vld [vmem:[#allocation8 + $0x90] sm:$0xff]  ;;  %v893_v36 = vpack.c.bf16 %v404_v25, %v402_v24  ;;  %v895_v46 = vpack.c.bf16 %v403_v27, %v401_v26  ;;  %p1128_p3 = scmp.lt.s32.totalorder %s1494_s22, %s1126_s10  ;;  %p1129_p5 = scmp.lt.s32.totalorder %s1127_s12, %s1121_s13 }
  0x75   : > { %884 = vmatpush1.bf16.msra.mxu0 %v883_v14  ;;  %v406_v31 = vld [vmem:[#allocation6 + $0xa8] sm:$0xff]  ;;  %v909_v32 = vpack.c.bf16 %v529_v29, %v528_v28  ;;  %v512_v33 = vld [vmem:[#allocation8] sm:$0xff]  ;;  %v531_v38 = vld [vmem:[#allocation8 + $0x98] sm:$0xff]  ;;  %p1124_p10 = pneg %p1123_p1 }
  0x76   : > { %886 = vmatprep.subr.bf16.mxu0 %v885_v15  ;;  %v513_v34 = vld [vmem:[#allocation8 + $0x8] sm:$0xff]  ;;  %v514_v39 = vld [vmem:[#allocation8 + $0x10] sm:$0xff]  ;;  %v515_v40 = vld [vmem:[#allocation8 + $0x18] sm:$0xff]  ;;  %v913_v42 = vpack.c.bf16 %v531_v38, %v530_v35  ;;  %p1130_p9 = por %p1129_p5, %p1128_p3 }
  0x77   : > { %v911_v37 = vpack.c.bf16 %v513_v34, %v512_v33  ;;  %v408_v41 = vld [vmem:[#allocation6 + $0xb8] sm:$0xff]  ;;  %910 = vmatprep.subr.bf16.mxu1 %v909_v32  ;;  %v532_v43 = vld [vmem:[#allocation8 + $0xa0] sm:$0xff]  ;;  %v533_v44 = vld [vmem:[#allocation8 + $0xa8] sm:$0xff]  ;;  %v915_v45 = vpack.c.bf16 %v515_v40, %v514_v39 }
  0x78   : > { %v405_v47 = vld [vmem:[#allocation6 + $0xa0] sm:$0xff]  ;;  %v917_v48 = vpack.c.bf16 %v533_v44, %v532_v43  ;;  %v517_v50 = vld [vmem:[#allocation8 + $0x28] sm:$0xff]  ;;  %v897_v51 = vpack.c.bf16 %v408_v41, %v406_v31  ;;  %v407_v52 = vld [vmem:[#allocation6 + $0xb0] sm:$0xff]  ;;  %p1131_p11 = pnand %p1130_p9, %p1124_p10 }
  0x79   : > { %888 = vmatpush1.bf16.msra.mxu0 %v887_v20  ;;  %912 = vmatpush3.bf16.msra.mxu1 %v911_v37  ;;  %v516_v49 = vld [vmem:[#allocation8 + $0x20] sm:$0xff]  ;;  %v534_v53 = vld [vmem:[#allocation8 + $0xb0] sm:$0xff]  ;;  %v535_v54 = vld [vmem:[#allocation8 + $0xb8] sm:$0xff]  ;;  %v899_v58 = vpack.c.bf16 %v407_v52, %v405_v47 }
  0x7a   : > { %890 = vmatprep.subr.bf16.mxu0 %v889_v21  ;;  %914 = vmatprep.subr.bf16.mxu1 %v913_v42  ;;  %v410_v55 = vld [vmem:[#allocation6 + $0xc8] sm:$0xff]  ;;  %v412_v56 = vld [vmem:[#allocation6 + $0xd8] sm:$0xff]  ;;  %v919_v57 = vpack.c.bf16 %v517_v50, %v516_v49  ;;  %v409_v59 = vld [vmem:[#allocation6 + $0xc0] sm:$0xff]  ;;  %v921_v60 = vpack.c.bf16 %v535_v54, %v534_v53 }
  0x7b   : > { %v518_v61 = vld [vmem:[#allocation8 + $0x30] sm:$0xff]  ;;  %v519_v62 = vld [vmem:[#allocation8 + $0x38] sm:$0xff]  ;;  %v901_v63 = vpack.c.bf16 %v412_v56, %v410_v55  ;;  %v536_v2 = vld [vmem:[#allocation8 + $0xc0] sm:$0xff] }
  0x7c   : > { %v411_v1 = vld [vmem:[#allocation6 + $0xd0] sm:$0xff]  ;;  %v537_v3 = vld [vmem:[#allocation8 + $0xc8] sm:$0xff]  ;;  %v416_v5 = vld [vmem:[#allocation6 + $0xf8] sm:$0xff]  ;;  %v923_v6 = vpack.c.bf16 %v519_v62, %v518_v61 }
  0x7d   : > { %892 = vmatpush1.bf16.msra.mxu0 %v891_v30  ;;  %916 = vmatpush3.bf16.msra.mxu1 %v915_v45  ;;  %v414_v4 = vld [vmem:[#allocation6 + $0xe8] sm:$0xff]  ;;  %v903_v7 = vpack.c.bf16 %v411_v1, %v409_v59  ;;  %v413_v8 = vld [vmem:[#allocation6 + $0xe0] sm:$0xff]  ;;  %v925_v9 = vpack.c.bf16 %v537_v3, %v536_v2  ;;  %v415_v13 = vld [vmem:[#allocation6 + $0xf0] sm:$0xff] }
  0x7e   : > { %894 = vmatprep.subr.bf16.mxu0 %v893_v36  ;;  %918 = vmatprep.subr.bf16.mxu1 %v917_v48  ;;  %v520_v10 = vld [vmem:[#allocation8 + $0x40] sm:$0xff]  ;;  %v521_v11 = vld [vmem:[#allocation8 + $0x48] sm:$0xff]  ;;  %v905_v12 = vpack.c.bf16 %v416_v5, %v414_v4  ;;  %v538_v14 = vld [vmem:[#allocation8 + $0xd0] sm:$0xff]  ;;  %v907_v17 = vpack.c.bf16 %v415_v13, %v413_v8  ;;  %v419_v36 = vlaneseq }
  0x7f   : > { %v539_v15 = vld [vmem:[#allocation8 + $0xd8] sm:$0xff]  ;;  %v927_v16 = vpack.c.bf16 %v521_v11, %v520_v10  ;;  %v522_v19 = vld [vmem:[#allocation8 + $0x50] sm:$0xff]  ;;  %v540_v21 = vld [vmem:[#allocation8 + $0xe0] sm:$0xff] }
  0x80   : > { %v929_v18 = vpack.c.bf16 %v539_v15, %v538_v14  ;;  %v523_v20 = vld [vmem:[#allocation8 + $0x58] sm:$0xff]  ;;  %v541_v22 = vld [vmem:[#allocation8 + $0xe8] sm:$0xff]  ;;  %v383_v24 = vld [vmem:[%s1460_s24] sm:$0xff]  ;;  %v420_v37 = vshrl.u32 %v419_v36, 7 }
  0x81   : > { %896 = vmatpush1.bf16.msra.mxu0 %v895_v46  ;;  %920 = vmatpush3.bf16.msra.mxu1 %v919_v57  ;;  %v931_v23 = vpack.c.bf16 %v523_v20, %v522_v19  ;;  %v933_v25 = vpack.c.bf16 %v541_v22, %v540_v21  ;;  %v384_v26 = vld [vmem:[%s1460_s24 + $0x8] sm:$0xff]  ;;  %v524_v27 = vld [vmem:[#allocation8 + $0x60] sm:$0xff]  ;;  %v542_v30 = vld [vmem:[#allocation8 + $0xf0] sm:$0xff] }
  0x82   : > { %898 = vmatprep.subr.bf16.mxu0 %v897_v51  ;;  %922 = vmatprep.subr.bf16.mxu1 %v921_v60  ;;  %v525_v28 = vld [vmem:[#allocation8 + $0x68] sm:$0xff]  ;;  %v543_v31 = vld [vmem:[#allocation8 + $0xf8] sm:$0xff]  ;;  %v526_v33 = vld [vmem:[#allocation8 + $0x70] sm:$0xff]  ;;  %v421_v38 = vsub.s32 0, %v420_v37  ;;  %v425_v39 = vsub.s32 1, %v420_v37 }
  0x83   : > { %v935_v29 = vpack.c.bf16 %v525_v28, %v524_v27  ;;  %v937_v32 = vpack.c.bf16 %v543_v31, %v542_v30  ;;  %v527_v34 = vld [vmem:[#allocation8 + $0x78] sm:$0xff]  ;;  %v829_v56 = vld [vmem:[%s1547_s4] ss:$0 sm:$0xff] }
  0x84   : > { %v939_v35 = vpack.c.bf16 %v527_v34, %v526_v33  ;;  %v831_v19 = vld [vmem:[%s1549_s6] ss:$0 sm:$0xff] }
  0x85   : > { %900 = vmatpush1.bf16.msra.mxu0 %v899_v58  ;;  %924 = vmatpush3.bf16.msra.mxu1 %v923_v6 }
  0x86   : > { %902 = vmatprep.subr.bf16.mxu0 %v901_v63  ;;  %926 = vmatprep.subr.bf16.mxu1 %v925_v9 }
  0x89   : > { %904 = vmatpush1.bf16.msra.mxu0 %v903_v7  ;;  %928 = vmatpush3.bf16.msra.mxu1 %v927_v16 }
  0x8a   : > { %906 = vmatprep.subr.bf16.mxu0 %v905_v12  ;;  %930 = vmatprep.subr.bf16.mxu1 %v929_v18 }
  0x8d   : > { %908 = vmatpush1.bf16.msra.mxu0 %v907_v17  ;;  %932 = vmatpush3.bf16.msra.mxu1 %v931_v23  ;;  %v830_v17 = vld [vmem:[%s1548_s5] ss:$0 sm:$0xff] }
  0x8e   : > { %934 = vmatprep.subr.bf16.mxu1 %v933_v25 }
  0x90   : > { %494 = vmatmul.mubr.f32.vlgmr.msra.gmra.mrb[0].mxu0 %v383_v24 }
  0x91   : > { %499 = vmatprep.mubr.f32.mxu0 %v1216_v0  ;;  %936 = vmatpush3.bf16.msra.mxu1 %v935_v29  ;;  %v417_v0 = vld [vmem:[%s1545_s2] sm:$0x3] }
  0x92   : > { %938 = vmatprep.subr.bf16.mxu1 %v937_v32  ;;  %v422_v40 = vrot.slane %v417_v0, %v421_v38  ;;  %v426_v41 = vrot.slane %v417_v0, %v425_v39 }
  0x94   : > { %500 = vmatmul.mubr.f32.gmra.mrb[2].mxu0 %v384_v26 }
  0x95   : > { %940 = vmatpush3.bf16.msra.mxu1 %v939_v35 }
 0x163   : > { %v495_v42 = vpop.f32.mrb[0].mxu0 }
 0x164   : > { %v496_v43 = vadd.f32 %v495_v42, %v422_v40  ;;  %v497_v44 = vpop.f32.mrb[1].mxu0 }
 0x165   : > { %v498_v45 = vadd.f32 %v497_v44, %v426_v41 }
 0x166   : > { %v506_v48 = vmax.f32 %v496_v43, 0.0 }
 0x167   : > { %v501_v46 = vpop.f32.mrb[2].mxu0  ;;  %v507_v47 = vmax.f32 %v498_v45, 0.0 }
 0x168   : > { %v502_v49 = vadd.f32 %v501_v46, %v422_v40  ;;  %v503_v50 = vpop.f32.mrb[3].mxu0 }
 0x169   : > { %v504_v51 = vadd.f32 %v503_v50, %v426_v41  ;;  %608 = vmatprep.mubr.f32.mxu1 %v507_v47 }
 0x16a   : > { %609 = vmatmul.mubr.f32.vlgmr.msra.gmra.mrb[0].mxu1 %v506_v48  ;;  %v508_v53 = vmax.f32 %v502_v49, 0.0 }
 0x16b   : > { %v509_v52 = vmax.f32 %v504_v51, 0.0 }
 0x16d   : > { %613 = vmatprep.mubr.f32.mxu1 %v509_v52 }
 0x16e   : > { %614 = vmatmul.mubr.f32.gmra.mrb[2].mxu1 %v508_v53 }
 0x23d   : > { %v871_v54 = vpop.f32.mrb[0].mxu1 }
 0x23e   : > { %v872_v55 = vpop.f32.mrb[1].mxu1 }
 0x23f   : > { %v873_v57 = vadd.f32 %v872_v55, %v871_v54 }
 0x241   : > { %v635_v58 = vadd.f32 %v873_v57, %v829_v56  ;;  %v874_v59 = vpop.f32.mrb[2].mxu1 }
 0x242   : > { %v875_v60 = vpop.f32.mrb[3].mxu1 }
 0x243   : > { %v876_v61 = vadd.f32 %v875_v60, %v874_v59  ;;  %v639_v62 = vadd.f32 %v635_v58, %v383_v24 }
 0x245   : > { %v636_v63 = vadd.f32 %v876_v61, %v829_v56  ;;  %641 = vadd.xlane.f32.xlu0 %v639_v62 }
 0x247   : > { %v640_v1 = vadd.f32 %v636_v63, %v384_v26 }
 0x249   : > { %643 = vadd.xlane.f32.xlu0 %v640_v1 }
 0x2d2   : > { %v642_v2 = vpop.xlane.xlu0 %641 }
 0x2d3   : > { %v646_v3 = vmul.f32 0.0078125, %v642_v2 }
 0x2d5   : > { %v648_v4 = vsub.f32 %v639_v62, %v646_v3 }
 0x2d6   : > { %v644_v5 = vpop.xlane.xlu0 %643 }
 0x2d7   : > { %v647_v6 = vmul.f32 0.0078125, %v644_v5  ;;  %v650_v7 = vmul.f32 %v648_v4, %v648_v4 }
 0x2d9   : > { %v649_v8 = vsub.f32 %v640_v1, %v647_v6  ;;  %652 = vadd.xlane.f32.xlu1 %v650_v7 }
 0x2db   : > { %v651_v9 = vmul.f32 %v649_v8, %v649_v8 }
 0x2dd   : > { %654 = vadd.xlane.f32.xlu1 %v651_v9 }
 0x366   : > { %v653_v10 = vpop.xlane.xlu1 %652 }
 0x367   : > { %v656_v11 = vmul.f32 0.0078125, %v653_v10 }
 0x369   : > { %v658_v12 = vadd.f32 1e-05, %v656_v11 }
 0x36a   : > { %v655_v13 = vpop.xlane.xlu1 %654 }
 0x36b   : > { %1031 = vrsqrt.f32 %v658_v12  ;;  %v657_v14 = vmul.f32 0.0078125, %v655_v13 }
 0x36d   : > { %v659_v15 = vadd.f32 1e-05, %v657_v14 }
 0x36f   : > { %1033 = vrsqrt.f32 %v659_v15 }
 0x375   : > { %v1032_v16 = vpop.eup %1031 }
 0x376   : > { %v662_v18 = vmul.f32 %v1032_v16, %v648_v4 }
 0x378   : > { %v671_v20 = vmul.f32 %v830_v17, %v662_v18 }
 0x379   : > { %v1034_v21 = vpop.eup %1033 }
 0x37a   : > { %v680_v22 = vadd.f32 %v831_v19, %v671_v20  ;;  %v663_v23 = vmul.f32 %v1034_v21, %v649_v8 }
 0x37c   : > { %v672_v24 = vmul.f32 %v830_v17, %v663_v23  ;;  %682 = vst [vmem:[%s367_s15] sm:$0xff] %v680_v22 }
 0x37e   : > { %v681_v25 = vadd.f32 %v831_v19, %v672_v24 }
 0x380   : > { %683 = vst [vmem:[%s367_s15 + $0x8] sm:$0xff] %v681_v25 }
 0x381   : > { %1134 = shalt.err (!%p1131_p11)
}
 0x382   : > { %s1135_s17 = scalar_lea.hbm %s1492_s9, 256  ;;  %s1139_s18 = scalar_lea.hbm %s1550_s7, 512 }
 0x383   : > { %p1136_p0 = scmp.ne.s32.totalorder %s1492_s9, %s1135_s17  ;;  %p1140_p6 = scmp.lt.u32.totalorder %s1492_s9, %s1550_s7 }
 0x384   : > { %p1141_p7 = scmp.lt.u32.totalorder %s1139_s18, %s1135_s17  ;;  %p1143_p8 = scmp.lt.u32.totalorder %s1135_s17, %s1492_s9 }
 0x385   : > { %p1137_p4 = pnand %p1136_p0, %p1571_p12 }
 0x386   : > { %p1142_p2 = por %p1141_p7, %p1140_p6 }
 0x387   : > { %p1138_p13 = pneg %p1137_p4 }
 0x388   : > { %p1144_p1 = por %p1143_p8, %p1142_p2 }
 0x38a   : > { %p1145_p10 = pnand %p1144_p1, %p1138_p13 }
 0x38c   : > { %1148 = shalt.err (!%p1145_p10)
}
 0x38d   : > { %s1218_s23 = smov 128   ;;  %s1219_s24 = smov 8  }
 0x38e   : > { %951 = dma.vmem_to_hbm [thread:$0]  (%p1571_p12), %s1494_s22, 256, %s1492_s9, %s685_s11, %s1218_s23, %s1218_s23, %s1219_s24  }
 0x38f PF: > { %s1572_s13 = sld [smem:[#allocation13_spill]]  ;;  %s1573_s27 = sld [smem:[#allocation14_spill]] }
 0x390   : > { %p1575_p5 = scmp.ge.s32.totalorder %s1207_s29, 2 }
 0x395   : > { %s713_s10 = sand.u32 1, %s1572_s13   ;;  %p1574_p3 = scmp.ne.s32.totalorder %s1573_s27, 0 }
 0x396   : > { %s714_s12 = scalar_lea.sflag [#allocation5], %s713_s10 }
 0x397   : > { %p965_p9 = pnand %p1575_p5, %p1574_p3 }
 0x399   : > { %1182 = dma.done.wait (!%p965_p9), %s714_s12, 256  }
 0x39a   : > { %1184 = vsyncadd (!%p965_p9), %s714_s12, 4294967040  ;;  %s24_s29 = sadd.s32 1, %s1207_s29   ;;  %s1576_s24 = smov %s1191_s25 }
 0x39b   : > { %p21_p11 = scmp.ge.s32.totalorder %s24_s29, 4   ;;  %s1577_s25 = smov %s1195_s26 }
 0x39c   : > { %s1578_s26 = smov %s1405_s8  ;;  %s1579_s27 = smov %s1203_s28 }
 0x39d   : > { %s1580_s28 = smov %s1582_s20  ;;  %23 = sbr.rel (!%p21_p11) target bundleno = 7 (0x7), region = 114 }
 0x3a4   :  { %719 = vsyncpa [#allocation4], 1 }
 0x3a5   :  { %721 = vsyncpa [#allocation4 + $0x1], 1 }
 0x3a6   :  { %722 = vsyncpa [#allocation7], 1 }
 0x3a7   :  { %723 = vsyncpa [#allocation5], 1 }
 0x3a8   :  { %725 = vsyncpa [#allocation5 + $0x1], 1 }

</bundles_post_ra>
